<compile_context>
chip_gen: v5e
topology: v5e:2x2
jax: 0.10.0
libtpu: 0.0.40
codegen_flags: <defaults>
</compile_context>

<pallas_src>
import functools

import jax
import jax.numpy as jnp
import numpy as np
from jax.experimental import pallas as pl
from jax.experimental.pallas import tpu as pltpu


def _round_up(x, m):
    return (x + m - 1) // m * m


def _conv_stats_kernel(x_ref, w_ref, conv_ref, sum_ref, sq_ref, *, tile_h, kh, kw):
    """One output row-tile: 3x3 conv as ONE K-fused MXU matmul + partial BN stats.

    x_ref:    (H+2, W+2, Cin)        padded image of this batch element (VMEM resident)
    w_ref:    (KH*KW*Cin, Cpad)      channels-last weight, Cout lane-padded
    conv_ref: (tile_h, W, Cpad)      fp32 conv output tile
    sum_ref:  (1, Cpad)              partial  sum   over this tile's rows
    sq_ref:   (1, Cpad)              partial sum^2  over this tile's rows
    """
    w_out = conv_ref.shape[1]
    cin = x_ref.shape[-1]
    cpad = conv_ref.shape[-1]

    t = pl.program_id(1)
    r0 = pl.multiple_of(t * tile_h, tile_h)  # first padded input row of this tile

    # Gather the KH*KW shifted taps from the VMEM-resident padded image and
    # K-fuse them: LHS (tile_h*W, KH*KW*Cin) @ W (KH*KW*Cin, Cpad) -> one MXU push.
    slabs = []
    for di in range(kh):
        for dj in range(kw):
            slabs.append(x_ref[pl.ds(r0 + di, tile_h), pl.ds(dj, w_out), :])
    patches = jnp.concatenate(slabs, axis=-1)                 # (tile_h, W, KH*KW*Cin)
    lhs = patches.reshape(tile_h * w_out, kh * kw * cin)

    acc = jnp.dot(lhs, w_ref[...], preferred_element_type=jnp.float32)

    conv_ref[...] = acc.reshape(tile_h, w_out, cpad)

    # One-pass partial statistics (no extra (x-mean)^2 pass over the tile).
    sum_ref[...] = jnp.sum(acc, axis=0, keepdims=True)
    sq_ref[...] = jnp.sum(acc * acc, axis=0, keepdims=True)


def _bn_relu_kernel(conv_ref, scale_ref, shift_ref, out_ref):
    """Lane-dense fused affine + ReLU on one conv-output row tile."""
    cpad = out_ref.shape[-1]
    scale = scale_ref[...].reshape(1, 1, cpad)
    shift = shift_ref[...].reshape(1, 1, cpad)
    out_ref[...] = jnp.maximum(conv_ref[...] * scale + shift, 0.0)


def _pick_tile_h(h, w):
    best = 1
    for d in range(1, h + 1):
        if h % d == 0 and d * w <= 1024:   # ~1K output rows per tile
            best = d
    return best


def conv_bn_relu(x_nchw, weight_oihw, gamma, beta, *, eps=1e-5, tile_h=None,
                 compute_dtype=jnp.bfloat16):
    """relu(batchnorm(conv3x3_s1_p1(x))), BN uses training-mode batch statistics."""
    n, cin, h, w = x_nchw.shape
    cout, cin_w, kh, kw = weight_oihw.shape
    assert cin == cin_w and (kh, kw) == (3, 3)

    if tile_h is None:
        tile_h = _pick_tile_h(h, w)
    assert h % tile_h == 0
    t_tiles = h // tile_h
    cpad = _round_up(cout, 128)          # lane-dense output channels
    k_taps = kh * kw * cin

    # ---- layout glue (XLA): NCHW -> padded NHWC, channels-last weight --------
    # TODO(synk): if the surrounding model is NHWC end-to-end these boundary
    # transposes disappear entirely.
    x_nhwc = jnp.transpose(x_nchw, (0, 2, 3, 1))
    x_pad = jnp.pad(x_nhwc, ((0, 0), (1, 1), (1, 1), (0, 0))).astype(compute_dtype)
    w_mat = jnp.transpose(weight_oihw, (2, 3, 1, 0)).reshape(k_taps, cout)
    w_mat = jnp.pad(w_mat, ((0, 0), (0, cpad - cout))).astype(compute_dtype)

    grid = (n, t_tiles)
    par = pltpu.CompilerParams(dimension_semantics=("parallel", "parallel"))

    # ---- phase 1: conv (single K-fused matmul per tile) + partial BN stats ---
    conv_out, part_sum, part_sq = pl.pallas_call(
        functools.partial(_conv_stats_kernel, tile_h=tile_h, kh=kh, kw=kw),
        grid=grid,
        in_specs=[
            pl.BlockSpec((None, h + 2, w + 2, cin), lambda i, t: (i, 0, 0, 0)),
            pl.BlockSpec((k_taps, cpad), lambda i, t: (0, 0)),
        ],
        out_specs=[
            pl.BlockSpec((None, tile_h, w, cpad), lambda i, t: (i, t, 0, 0)),
            pl.BlockSpec((None, None, 1, cpad), lambda i, t: (i, t, 0, 0)),
            pl.BlockSpec((None, None, 1, cpad), lambda i, t: (i, t, 0, 0)),
        ],
        out_shape=[
            jax.ShapeDtypeStruct((n, h, w, cpad), jnp.float32),
            jax.ShapeDtypeStruct((n, t_tiles, 1, cpad), jnp.float32),
            jax.ShapeDtypeStruct((n, t_tiles, 1, cpad), jnp.float32),
        ],
        compiler_params=par,
    )(x_pad, w_mat)

    # ---- per-channel BN math on tiny (Cpad,) vectors (plain XLA) -------------
    count = jnp.float32(n * h * w)
    total = jnp.sum(part_sum, axis=(0, 1, 2))
    total_sq = jnp.sum(part_sq, axis=(0, 1, 2))
    mean = total / count
    var = jnp.maximum(total_sq / count - mean * mean, 0.0)     # biased variance
    gamma_p = jnp.pad(gamma.astype(jnp.float32), (0, cpad - cout))
    beta_p = jnp.pad(beta.astype(jnp.float32), (0, cpad - cout))
    scale_v = gamma_p * jax.lax.rsqrt(var + eps)
    shift_v = beta_p - mean * scale_v
    scale = scale_v.reshape(1, cpad).astype(jnp.float32)
    shift = shift_v.reshape(1, cpad).astype(jnp.float32)

    # ---- phase 2: lane-dense tiled affine + ReLU ------------------------------
    y_pad = pl.pallas_call(
        _bn_relu_kernel,
        grid=grid,
        in_specs=[
            pl.BlockSpec((None, tile_h, w, cpad), lambda i, t: (i, t, 0, 0)),
            pl.BlockSpec((1, cpad), lambda i, t: (0, 0)),
            pl.BlockSpec((1, cpad), lambda i, t: (0, 0)),
        ],
        out_specs=pl.BlockSpec((None, tile_h, w, cpad), lambda i, t: (i, t, 0, 0)),
        out_shape=jax.ShapeDtypeStruct((n, h, w, cpad), jnp.float32),
        compiler_params=par,
    )(conv_out, scale, shift)

    # ---- glue back: drop Cout lane padding, NHWC -> NCHW ----------------------
    out = y_pad[:, :, :, :cout]
    return jnp.transpose(out, (0, 3, 1, 2))
    # TODO(synk): BatchNorm running_mean/running_var momentum updates (stateful
    # nn.BatchNorm2d training-mode side effect) are not reproduced here.


def _reference(x_nchw, weight_oihw, gamma, beta, eps=1e-5):
    y = jax.lax.conv_general_dilated(
        x_nchw, weight_oihw, window_strides=(1, 1), padding=((1, 1), (1, 1)),
        dimension_numbers=("NCHW", "OIHW", "NCHW"))
    mean = jnp.mean(y, axis=(0, 2, 3), keepdims=True)
    var = jnp.mean((y - mean) ** 2, axis=(0, 2, 3), keepdims=True)
    yn = (y - mean) * jax.lax.rsqrt(var + eps)
    yn = yn * gamma.reshape(1, -1, 1, 1) + beta.reshape(1, -1, 1, 1)
    return jnp.maximum(yn, 0.0)


if __name__ == "__main__":
    key = jax.random.PRNGKey(0)
    k_x, k_w, k_g, k_b = jax.random.split(key, 4)

    N, CIN, COUT, H, W = 2, 4, 8, 16, 16
    x = jax.random.normal(k_x, (N, CIN, H, W), jnp.float32)
    weight = 0.1 * jax.random.normal(k_w, (COUT, CIN, 3, 3), jnp.float32)  # conv.weight
    gamma = 1.0 + 0.1 * jax.random.normal(k_g, (COUT,), jnp.float32)       # bn.weight
    beta = 0.1 * jax.random.normal(k_b, (COUT,), jnp.float32)              # bn.bias

    ref = jax.block_until_ready(_reference(x, weight, gamma, beta))

    # Default bf16 MXU path: compare against a reference with bf16-quantized
    # conv inputs/weights (products are exact in fp32 accumulation).
    out_bf16 = jax.block_until_ready(conv_bn_relu(x, weight, gamma, beta, tile_h=8))
    assert out_bf16.shape == (N, COUT, H, W)
    ref_bf16 = jax.block_until_ready(_reference(
        x.astype(jnp.bfloat16).astype(jnp.float32),
        weight.astype(jnp.bfloat16).astype(jnp.float32), gamma, beta))
    np.testing.assert_allclose(np.asarray(out_bf16), np.asarray(ref_bf16),
                               atol=5e-3, rtol=5e-3)

    # fp32 path: tight check of the conv / BN / ReLU plumbing.
    out_f32 = jax.block_until_ready(
        conv_bn_relu(x, weight, gamma, beta, tile_h=8, compute_dtype=jnp.float32))
    np.testing.assert_allclose(np.asarray(out_f32), np.asarray(ref),
                               atol=2e-4, rtol=2e-4)

    print("KERNEL_OK")
</pallas_src>

<mosaic_0001>
module attributes {stable_mosaic.version = 11 : i64} {
  func.func @_conv_stats_kernel(%arg0: i32, %arg1: i32, %arg2: memref<1x18x18x4xbf16, #tpu.memory_space<vmem>>, %arg3: memref<36x128xbf16, #tpu.memory_space<vmem>>, %arg4: memref<1x8x16x128xf32, #tpu.memory_space<vmem>>, %arg5: memref<1x1x1x128xf32, #tpu.memory_space<vmem>>, %arg6: memref<1x1x1x128xf32, #tpu.memory_space<vmem>>) attributes {dimension_semantics = [#tpu.dimension_semantics<parallel>, #tpu.dimension_semantics<parallel>], iteration_bounds = array<i64: 2, 2>, scalar_prefetch = 0 : i64, scratch_operands = 0 : i64, tpu.core_type = #tpu.core_type<tc>, window_params = [{transform_indices = @transform_0, window_bounds = array<i64: 1, 18, 18, 4>}, {pipeline_mode = #tpu.pipeline_mode<synchronous>, transform_indices = @transform_1, window_bounds = array<i64: 36, 128>}, {transform_indices = @transform_2, window_bounds = array<i64: 1, 8, 16, 128>}, {transform_indices = @transform_3, window_bounds = array<i64: 1, 1, 1, 128>}, {transform_indices = @transform_4, window_bounds = array<i64: 1, 1, 1, 128>}]} {
    %c8_i32 = arith.constant 8 : i32
    %0 = arith.muli %arg1, %c8_i32 : i32
    %1 = tpu.assume_multiple %0, 8 : i32
    %c0_i32 = arith.constant 0 : i32
    %2 = arith.addi %1, %c0_i32 : i32
    %c0 = arith.constant 0 : index
    %3 = arith.index_cast %2 : i32 to index
    %c0_0 = arith.constant 0 : index
    %c0_1 = arith.constant 0 : index
    %4 = vector.load %arg2[%c0, %3, %c0_0, %c0_1] : memref<1x18x18x4xbf16, #tpu.memory_space<vmem>>, vector<1x8x16x4xbf16>
    %5 = vector.shape_cast %4 : vector<1x8x16x4xbf16> to vector<8x16x4xbf16>
    %c0_i32_2 = arith.constant 0 : i32
    %6 = arith.addi %1, %c0_i32_2 : i32
    %c0_3 = arith.constant 0 : index
    %7 = arith.index_cast %6 : i32 to index
    %c1 = arith.constant 1 : index
    %c0_4 = arith.constant 0 : index
    %8 = vector.load %arg2[%c0_3, %7, %c1, %c0_4] : memref<1x18x18x4xbf16, #tpu.memory_space<vmem>>, vector<1x8x16x4xbf16>
    %9 = vector.shape_cast %8 : vector<1x8x16x4xbf16> to vector<8x16x4xbf16>
    %c0_i32_5 = arith.constant 0 : i32
    %10 = arith.addi %1, %c0_i32_5 : i32
    %c0_6 = arith.constant 0 : index
    %11 = arith.index_cast %10 : i32 to index
    %c2 = arith.constant 2 : index
    %c0_7 = arith.constant 0 : index
    %12 = vector.load %arg2[%c0_6, %11, %c2, %c0_7] : memref<1x18x18x4xbf16, #tpu.memory_space<vmem>>, vector<1x8x16x4xbf16>
    %13 = vector.shape_cast %12 : vector<1x8x16x4xbf16> to vector<8x16x4xbf16>
    %c1_i32 = arith.constant 1 : i32
    %14 = arith.addi %1, %c1_i32 : i32
    %c0_8 = arith.constant 0 : index
    %15 = arith.index_cast %14 : i32 to index
    %c0_9 = arith.constant 0 : index
    %c0_10 = arith.constant 0 : index
    %16 = vector.load %arg2[%c0_8, %15, %c0_9, %c0_10] : memref<1x18x18x4xbf16, #tpu.memory_space<vmem>>, vector<1x8x16x4xbf16>
    %17 = vector.shape_cast %16 : vector<1x8x16x4xbf16> to vector<8x16x4xbf16>
    %c1_i32_11 = arith.constant 1 : i32
    %18 = arith.addi %1, %c1_i32_11 : i32
    %c0_12 = arith.constant 0 : index
    %19 = arith.index_cast %18 : i32 to index
    %c1_13 = arith.constant 1 : index
    %c0_14 = arith.constant 0 : index
    %20 = vector.load %arg2[%c0_12, %19, %c1_13, %c0_14] : memref<1x18x18x4xbf16, #tpu.memory_space<vmem>>, vector<1x8x16x4xbf16>
    %21 = vector.shape_cast %20 : vector<1x8x16x4xbf16> to vector<8x16x4xbf16>
    %c1_i32_15 = arith.constant 1 : i32
    %22 = arith.addi %1, %c1_i32_15 : i32
    %c0_16 = arith.constant 0 : index
    %23 = arith.index_cast %22 : i32 to index
    %c2_17 = arith.constant 2 : index
    %c0_18 = arith.constant 0 : index
    %24 = vector.load %arg2[%c0_16, %23, %c2_17, %c0_18] : memref<1x18x18x4xbf16, #tpu.memory_space<vmem>>, vector<1x8x16x4xbf16>
    %25 = vector.shape_cast %24 : vector<1x8x16x4xbf16> to vector<8x16x4xbf16>
    %c2_i32 = arith.constant 2 : i32
    %26 = arith.addi %1, %c2_i32 : i32
    %c0_19 = arith.constant 0 : index
    %27 = arith.index_cast %26 : i32 to index
    %c0_20 = arith.constant 0 : index
    %c0_21 = arith.constant 0 : index
    %28 = vector.load %arg2[%c0_19, %27, %c0_20, %c0_21] : memref<1x18x18x4xbf16, #tpu.memory_space<vmem>>, vector<1x8x16x4xbf16>
    %29 = vector.shape_cast %28 : vector<1x8x16x4xbf16> to vector<8x16x4xbf16>
    %c2_i32_22 = arith.constant 2 : i32
    %30 = arith.addi %1, %c2_i32_22 : i32
    %c0_23 = arith.constant 0 : index
    %31 = arith.index_cast %30 : i32 to index
    %c1_24 = arith.constant 1 : index
    %c0_25 = arith.constant 0 : index
    %32 = vector.load %arg2[%c0_23, %31, %c1_24, %c0_25] : memref<1x18x18x4xbf16, #tpu.memory_space<vmem>>, vector<1x8x16x4xbf16>
    %33 = vector.shape_cast %32 : vector<1x8x16x4xbf16> to vector<8x16x4xbf16>
    %c2_i32_26 = arith.constant 2 : i32
    %34 = arith.addi %1, %c2_i32_26 : i32
    %c0_27 = arith.constant 0 : index
    %35 = arith.index_cast %34 : i32 to index
    %c2_28 = arith.constant 2 : index
    %c0_29 = arith.constant 0 : index
    %36 = vector.load %arg2[%c0_27, %35, %c2_28, %c0_29] : memref<1x18x18x4xbf16, #tpu.memory_space<vmem>>, vector<1x8x16x4xbf16>
    %37 = vector.shape_cast %36 : vector<1x8x16x4xbf16> to vector<8x16x4xbf16>
    %38 = tpu.concatenate %5, %9, %13, %17, %21, %25, %29, %33, %37 in 2 : vector<8x16x4xbf16>, vector<8x16x4xbf16>, vector<8x16x4xbf16>, vector<8x16x4xbf16>, vector<8x16x4xbf16>, vector<8x16x4xbf16>, vector<8x16x4xbf16>, vector<8x16x4xbf16>, vector<8x16x4xbf16> -> vector<8x16x36xbf16>
    %39 = vector.shape_cast %38 : vector<8x16x36xbf16> to vector<128x36xbf16>
    %c0_30 = arith.constant 0 : index
    %c0_31 = arith.constant 0 : index
    %40 = vector.load %arg3[%c0_30, %c0_31] : memref<36x128xbf16, #tpu.memory_space<vmem>>, vector<36x128xbf16>
    %cst = arith.constant dense<0.000000e+00> : vector<128x128xf32>
    %41 = tpu.matmul %39, %40, %cst {dimension_numbers = #tpu.dot_dimension_numbers<[1], [0], [0], [1], [0, 0, 1, 1], [], []>} : vector<128x36xbf16>, vector<36x128xbf16>, vector<128x128xf32> -> vector<128x128xf32>
    %42 = vector.shape_cast %41 : vector<128x128xf32> to vector<8x16x128xf32>
    %c0_32 = arith.constant 0 : index
    %c0_33 = arith.constant 0 : index
    %c0_34 = arith.constant 0 : index
    %c0_35 = arith.constant 0 : index
    %43 = vector.load %arg4[%c0_32, %c0_33, %c0_34, %c0_35] : memref<1x8x16x128xf32, #tpu.memory_space<vmem>>, vector<1x8x16x128xf32>
    %44 = vector.shape_cast %43 : vector<1x8x16x128xf32> to vector<8x16x128xf32>
    %45 = vector.shape_cast %42 : vector<8x16x128xf32> to vector<1x8x16x128xf32>
    tpu.vector_store %arg4[%c0_32, %c0_33, %c0_34, %c0_35], %45 {strides = array<i32>} : memref<1x8x16x128xf32, #tpu.memory_space<vmem>>, vector<1x8x16x128xf32>,
    %cst_36 = arith.constant dense<0.000000e+00> : vector<128xf32>
    %46 = vector.multi_reduction <add>, %41, %cst_36 [0] : vector<128x128xf32> to vector<128xf32>
    %47 = vector.shape_cast %46 : vector<128xf32> to vector<1x128xf32>
    %c0_37 = arith.constant 0 : index
    %c0_38 = arith.constant 0 : index
    %c0_39 = arith.constant 0 : index
    %c0_40 = arith.constant 0 : index
    %48 = vector.load %arg5[%c0_37, %c0_38, %c0_39, %c0_40] : memref<1x1x1x128xf32, #tpu.memory_space<vmem>>, vector<1x1x1x128xf32>
    %49 = vector.shape_cast %48 : vector<1x1x1x128xf32> to vector<1x128xf32>
    %50 = vector.shape_cast %47 : vector<1x128xf32> to vector<1x1x1x128xf32>
    tpu.vector_store %arg5[%c0_37, %c0_38, %c0_39, %c0_40], %50 {strides = array<i32>} : memref<1x1x1x128xf32, #tpu.memory_space<vmem>>, vector<1x1x1x128xf32>,
    %51 = arith.mulf %41, %41 : vector<128x128xf32>
    %cst_41 = arith.constant dense<0.000000e+00> : vector<128xf32>
    %52 = vector.multi_reduction <add>, %51, %cst_41 [0] : vector<128x128xf32> to vector<128xf32>
    %53 = vector.shape_cast %52 : vector<128xf32> to vector<1x128xf32>
    %c0_42 = arith.constant 0 : index
    %c0_43 = arith.constant 0 : index
    %c0_44 = arith.constant 0 : index
    %c0_45 = arith.constant 0 : index
    %54 = vector.load %arg6[%c0_42, %c0_43, %c0_44, %c0_45] : memref<1x1x1x128xf32, #tpu.memory_space<vmem>>, vector<1x1x1x128xf32>
    %55 = vector.shape_cast %54 : vector<1x1x1x128xf32> to vector<1x128xf32>
    %56 = vector.shape_cast %53 : vector<1x128xf32> to vector<1x1x1x128xf32>
    tpu.vector_store %arg6[%c0_42, %c0_43, %c0_44, %c0_45], %56 {strides = array<i32>} : memref<1x1x1x128xf32, #tpu.memory_space<vmem>>, vector<1x1x1x128xf32>,
    return
  }
  func.func @transform_0(%arg0: i32, %arg1: i32) -> (i32, i32, i32, i32) {
    %c0_i32 = arith.constant 0 : i32
    %c0_i32_0 = arith.constant 0 : i32
    %c0_i32_1 = arith.constant 0 : i32
    %c0_i32_2 = arith.constant 0 : i32
    return %arg0, %c0_i32, %c0_i32_0, %c0_i32_1 : i32, i32, i32, i32
  }
  func.func @transform_1(%arg0: i32, %arg1: i32) -> (i32, i32) {
    %c0_i32 = arith.constant 0 : i32
    %c0_i32_0 = arith.constant 0 : i32
    %c0_i32_1 = arith.constant 0 : i32
    return %c0_i32, %c0_i32_0 : i32, i32
  }
  func.func @transform_2(%arg0: i32, %arg1: i32) -> (i32, i32, i32, i32) {
    %c0_i32 = arith.constant 0 : i32
    %c0_i32_0 = arith.constant 0 : i32
    %c0_i32_1 = arith.constant 0 : i32
    return %arg0, %arg1, %c0_i32, %c0_i32_0 : i32, i32, i32, i32
  }
  func.func @transform_3(%arg0: i32, %arg1: i32) -> (i32, i32, i32, i32) {
    %c0_i32 = arith.constant 0 : i32
    %c0_i32_0 = arith.constant 0 : i32
    %c0_i32_1 = arith.constant 0 : i32
    return %arg0, %arg1, %c0_i32, %c0_i32_0 : i32, i32, i32, i32
  }
  func.func @transform_4(%arg0: i32, %arg1: i32) -> (i32, i32, i32, i32) {
    %c0_i32 = arith.constant 0 : i32
    %c0_i32_0 = arith.constant 0 : i32
    %c0_i32_1 = arith.constant 0 : i32
    return %arg0, %arg1, %c0_i32, %c0_i32_0 : i32, i32, i32, i32
  }
}

</mosaic_0001>

<bundles_post_ra>
// kernel: tpu_custom_call.1
= control target key start
LH: loop header
LB: loop body
LE: loop exit
PB: predicated region body
PF: predicated region fallthrough
CT: control target
= control target key end

     0   :  { %s2759_s0 = inlined_call_operand.vmem [shape: bf16[2,18,18,4], index: 0, kind: input, shape index: {}]   ;;  %s2760_s1 = inlined_call_operand.vmem [shape: bf16[36,128], index: 1, kind: input, shape index: {}]   ;;  %s2761_s2 = inlined_call_operand.hbm [shape: f32[2,16,16,128], index: 2, kind: output, shape index: {0}]   ;;  %s2762_s3 = inlined_call_operand.hbm [shape: f32[2,2,1,128], index: 3, kind: output, shape index: {1}]   ;;  %s2763_s4 = inlined_call_operand.hbm [shape: f32[2,2,1,128], index: 4, kind: output, shape index: {2}]  }
   0x1   :  { %2767 = sst [smem:[#allocation9_spill]] %s2759_s0 }
   0x2   :  { %10 = vsyncpa [#allocation3], 0 }
   0x3   :  { %12 = vsyncpa [#allocation3 + $0x1], 0 }
   0x4   :  { %13 = vsyncpa [#allocation5], 0 }
   0x5   :  { %15 = vsyncpa [#allocation5 + $0x1], 0  ;;  %s2125_s15 = smov 0   ;;  %s2127_s16 = smov 0  }
   0x6   :  { %s2129_s17 = smov 0   ;;  %s2131_s18 = smov 0  }
   0x7   :  { %s2133_s19 = smov 0   ;;  %s2135_s20 = smov 0  }
   0x8   :  { %s2137_s21 = smov 0   ;;  %s2139_s22 = smov 0  }
   0x9 LB: > { %s2765_s23 = sadd.s32 4294967295, %s2089_s22   ;;  %s2764_s24 = sadd.s32 4294967294, %s2089_s22   ;;  %s2089_s22 = sphi %s2139_s22, %s21_s22   ;;  %s2085_s21 = sphi %s2137_s21, %s2780_s21   ;;  %s2081_s20 = sphi %s2135_s20, %s2779_s20   ;;  %s2077_s19 = sphi %s2133_s19, %s2778_s19   ;;  %s2073_s18 = sphi %s2131_s18, %s2777_s18   ;;  %s2069_s17 = sphi %s2129_s17, %s2776_s17   ;;  %s2065_s16 = sphi %s2127_s16, %s2775_s16   ;;  %s2061_s15 = sphi %s2125_s15, %s2774_s15  }
   0xa   : > { %s30_s25 = sadd.s32 1, %s2081_s20  ;;  %s33_s26 = sadd.s32 1, %s2085_s21 }
   0xb   : > { %p31_p0 = scmp.ge.s32.totalorder %s30_s25, 2  ;;  %p99_p1 = scmp.ne.s32.totalorder %s2069_s17, %s2065_s16 }
   0xc   : > { %p100_p2 = scmp.eq.s32.totalorder %s2765_s23, 3  ;;  %p105_p5 = scmp.ne.s32.totalorder %s2065_s16, %s2061_s15 }
   0xd   : > { %s2782_s25 = smov (%p31_p0, %s30_s25), 0  ;;  %s2784_s26 = smov (!%p31_p0, %s33_s26), %s2085_s21 }
   0xe   : > { %s85_s27 = ssub.s32 %s2081_s20, %s2782_s25  ;;  %p2178_p3 = por %p100_p2, %p99_p1 }
   0xf   : > { %p35_p4 = scmp.ge.s32.totalorder %s2784_s26, 2  ;;  %p106_p6 = scmp.eq.s32.totalorder %s2764_s24, 3 }
  0x10   : > { %p1600_p7 = scmp.ge.s32.totalorder %s2089_s22, 1  ;;  %p191_p9 = scmp.lt.s32.totalorder %s2089_s22, 5 }
  0x11   : > { %s2786_s26 = smov (%p35_p4, %s2784_s26), 0  ;;  %p2189_p8 = por %p106_p6, %p105_p5 }
  0x12   : > { %s84_s30 = ssub.s32 %s2085_s21, %s2786_s26  ;;  %s89_s5 = sadd.s32 1, %s2069_s17 }
  0x13   : > { %s86_s6 = sor.u32 %s85_s27, %s84_s30  ;;  %p192_p10 = pnand %p1600_p7, %p191_p9 }
  0x14   : > { %p87_p11 = scmp.eq.s32.totalorder %s86_s6, 0  ;;  %p225_p12 = scmp.lt.s32.totalorder (!%p192_p10), %s2077_s19, 1 }
  0x15   : > { %195 = sbr.rel (%p192_p10) target bundleno = 498 (0x1f2), region = 28  ;;  %s2770_s0 = sld [smem:[#allocation9_spill]] (!%p192_p10) }
  0x16   : > { %s2198_s7 = scalar_select %p87_p11, %s2069_s17, %s89_s5  }
  0x17   : > { %s1699_s9 = smul.u32 (!%p192_p10), 96, %s2073_s18  ;;  %s2091_s27 = smov (!%p192_p10), 24  }
  0x18   : > { %s2092_s30 = smov (!%p192_p10), 12   ;;  %s2766_s5 = smov (!%p192_p10), 8  }
  0x19   : > { %s2094_s6 = smov (!%p192_p10), 32   ;;  %s2098_s11 = smov (!%p192_p10), 28  }
  0x1a   : > { %s226_s8 = scalar_select %p225_p12, %s2077_s19, 1  ;;  %vm541_vm0 = vcmask 1046528   ;;  %vm404_vm1 = vsmask.f32 7424  ;;  %vm1267_vm2 = vcmask 1041408   ;;  %vm1094_vm3 = vcmask 31744  }
  0x1b   : > { %vm1111_vm4 = vcmask 64512   ;;  %vm1128_vm5 = vcmask 97280   ;;  %vm1145_vm6 = vcmask 130048   ;;  %vm1162_vm7 = vcmask 162816  }
  0x1c   : > { %s1807_s10 = smul.u32 216, %s226_s8  ;;  %s2095_s8 = smov 4   ;;  %vm1179_vm8 = vcmask 195584   ;;  %vm1196_vm9 = vcmask 228352   ;;  %vm1213_vm10 = vcmask 261120   ;;  %vm1250_vm11 = vcmask 293888  }
  0x1e   : > { %s229_s13 = scalar_lea.vmem %s2770_s0, %s1807_s10  ;;  %s2097_s10 = smov 16  }
  0x1f   : > { %s2206_s14 = scalar_lea.vmem %s229_s13, %s1699_s9  ;;  %s2096_s9 = smov 20  }
  0x20   : > { %v1608_v0 = vld [vmem:[%s2206_s14 + $0xc] sm:$0xff]   ;;  %v1762_v2 = vld [vmem:[%s2206_s14] sm:$0xf0]  ;;  %v252_v3 = vld [vmem:[%s2206_s14 + $0x8] sm:$0x1] }
  0x21   : > { %v2210_v1 = vld [vmem:[%s2206_s14 + $0xc] sm:$0xf0]  ;;  %v1763_v4 = vld [vmem:[%s2206_s14] sm:$0xe]  ;;  %v388_v5 = vunpack.c.l.b16 %v252_v3  ;;  %v1786_v6 = vld [vmem:[%s2206_s14 + $0x18] sm:$0xf0]  ;;  %622 = vrot.lane.b32.xlu1 %v1608_v0, %s2092_s30 }
  0x22   : > { %v1658_v7 = vld [vmem:[%s2206_s14 + $0x20] sm:$0x1]  ;;  %v1764_v8 = vor.u32 %v1763_v4, %v1762_v2  ;;  %v1787_v9 = vld [vmem:[%s2206_s14 + $0x18] sm:$0xe]  ;;  %v1624_v12 = vld [vmem:[%s2206_s14 + $0x14] sm:$0x1] }
  0x23   : > { %v902_v10 = vunpack.c.l.b16 %v1658_v7  ;;  %v2219_v11 = vld [vmem:[%s2206_s14] sm:$0xff]   ;;  %v396_v13 = vpack.c.b16 %v388_v5, %v388_v5  ;;  %v1788_v14 = vor.u32 %v1787_v9, %v1786_v6  ;;  %v2224_v16 = vld [vmem:[%s2206_s14 + $0x18] sm:$0xff]   ;;  %v646_v20 = vunpack.c.l.b16 %v1624_v12  ;;  %v1900_v38 = vld [vmem:[%s2206_s14 + $0xc] sm:$0xe] }
  0x24   : > { %v406_v15 = vshrl.u32 %v2219_v11, 16  ;;  %v542_v17 = vrot.slane %v1764_v8, 1  ;;  %v408_v19 = vshll.u32 %v2219_v11, 16  ;;  %878 = vrot.lane.b32.xlu2 %v2224_v16, %s2091_s27  ;;  %v665_v21 = vshll.u32 %v1608_v0, 16  ;;  %v256_v28 = vld [vmem:[%s2206_s14 + $0x38] sm:$0x1] }
  0x25   : > { %v910_v18 = vpack.c.b16 %v902_v10, %v902_v10  ;;  %v543_v22 = vrot.slane %v396_v13, 1  ;;  %v413_v23 = vshll.u32 %v396_v13, 16  ;;  %v1054_v24 = vrot.slane %v1788_v14, 1  ;;  %v254_v34 = vld [vmem:[%s2206_s14 + $0x20] sm:$0x1]  ;;  %v2238_v40 = vld [vmem:[%s2206_s14 + $0x30] sm:$0xff]  }
  0x26   : > { %v410_v26 = vrot.slane %v408_v19, 1  ;;  %v654_v27 = vpack.c.b16 %v646_v20, %v646_v20  ;;  %v663_v32 = vshrl.u32 %v1608_v0, 16  ;;  %v667_v33 = vrot.slane %v665_v21, 1  ;;  %v2242_v43 = vld [vmem:[%s2206_s14 + $0x24] sm:$0xff]   ;;  %v1626_v55 = vld [vmem:[%s2206_s14 + $0x2c] sm:$0x1] }
  0x27   : > { %v1055_v25 = vrot.slane %v910_v18, 1  ;;  %v544_v29 = vsel %vm541_vm0, %v542_v17, %v543_v22  ;;  %v415_v31 = vrot.slane %v413_v23, 1  ;;  %v921_v36 = vshll.u32 %v2224_v16, 16  ;;  %v2245_v44 = vld [vmem:[%s2206_s14 + $0x24] sm:$0xf0]  ;;  %v1616_v4 = vld [vmem:[%s2206_s14 + $0x3c] sm:$0xff]  }
  0x28   : > { %566 = vrot.lane.b32.xlu0 %v544_v29, %s2766_s5  ;;  %v411_v30 = vor.u32 %v410_v26, %v406_v15  ;;  %v670_v35 = vshll.u32 %v654_v27, 16  ;;  %v392_v37 = vunpack.c.l.b16 %v256_v28  ;;  %v919_v41 = vshrl.u32 %v2224_v16, 16  ;;  %v1765_v0 = vld [vmem:[%s2206_s14 + $0x18] sm:$0xf0]  ;;  %v2266_v5 = vld [vmem:[%s2206_s14 + $0x3c] sm:$0xf0] }
  0x29   : > { %v1056_v39 = vsel %vm541_vm0, %v1054_v24, %v1055_v25  ;;  %v390_v42 = vunpack.c.l.b16 %v254_v34  ;;  %v668_v46 = vor.u32 %v667_v33, %v663_v32  ;;  %v926_v47 = vshll.u32 %v910_v18, 16  ;;  %v1628_v14 = vld [vmem:[%s2206_s14 + $0x44] sm:$0x1]  ;;  %v1768_v23 = vld [vmem:[%s2206_s14 + $0x30] sm:$0xf0] }
  0x2a   : > { %v416_v45 = vsel %vm404_vm1, %v411_v30, %v415_v31  ;;  %1078 = vrot.lane.b32.xlu1 %v1056_v39, %s2094_s6  ;;  %v672_v48 = vrot.slane %v670_v35, 1  ;;  %v923_v49 = vrot.slane %v921_v36, 1  ;;  %v2249_v50 = vpack.c.b16 %v392_v37, %v392_v37  ;;  %v1769_v24 = vld [vmem:[%s2206_s14 + $0x30] sm:$0xe]  ;;  %v1903_v32 = vld [vmem:[%s2206_s14 + $0x24] sm:$0xe] }
  0x2b   : > { %v456_v51 = vshll.u32 %v2238_v40, 16  ;;  %v398_v52 = vpack.c.b16 %v390_v42, %v390_v42  ;;  %v1901_v53 = vor.u32 %v1900_v38, %v2210_v1  ;;  %v799_v54 = vrot.slane %v654_v27, 1  ;;  %v1766_v1 = vld [vmem:[%s2206_s14 + $0x18] sm:$0xe]  ;;  %v1660_v33 = vld [vmem:[%s2206_s14 + $0x38] sm:$0x1] }
  0x2c   : > { %v454_v56 = vshrl.u32 %v2238_v40, 16  ;;  %v2256_v59 = vor.u32 %v923_v49, %v919_v41  ;;  %v928_v60 = vrot.slane %v926_v47, 1  ;;  %v461_v62 = vshll.u32 %v2249_v50, 16  ;;  %v2292_v42 = vld [vmem:[%s2206_s14 + $0xc] sm:$0xff]  }
  0x2d   : > { %v798_v57 = vrot.slane %v1901_v53, 1  ;;  %v437_v58 = vshll.u32 %v398_v52, 16  ;;  %v458_v61 = vrot.slane %v456_v51, 1  ;;  %v673_v63 = vsel %vm404_vm1, %v668_v46, %v672_v48  ;;  %v1906_v51 = vld [vmem:[%s2206_s14 + $0x3c] sm:$0xe] }
  0x2e   : > { %v648_v3 = vunpack.c.l.b16 %v1626_v55  ;;  %v929_v7 = vsel %vm404_vm1, %v2256_v59, %v928_v60  ;;  %v463_v9 = vrot.slane %v461_v62, 1  ;;  %v1767_v10 = vor.u32 %v1766_v1, %v1765_v0  ;;  %v1662_v62 = vld [vmem:[%s2206_s14 + $0x50] sm:$0x1] }
  0x2f   : > { %v800_v2 = vsel %vm541_vm0, %v798_v57, %v799_v54  ;;  %v439_v6 = vrot.slane %v437_v58, 1  ;;  %v2271_v8 = vor.u32 %v458_v61, %v454_v56  ;;  %v689_v13 = vshll.u32 %v2242_v43, 16 }
  0x30   : > { %501 = vrot.lane.b32.xlu0 %v416_v45, %s2095_s8  ;;  %822 = vrot.lane.b32.xlu2 %v800_v2, %s2096_s9  ;;  %v656_v12 = vpack.c.b16 %v648_v3, %v648_v3  ;;  %v548_v18 = vrot.slane %v1767_v10, 1  ;;  %v549_v19 = vrot.slane %v398_v52, 1  ;;  %v687_v20 = vshrl.u32 %v2242_v43, 16  ;;  %v2295_v45 = vld [vmem:[%s2206_s14 + $0xc] sm:$0xf0]  ;;  %v2315_v2 = vld [vmem:[%s2206_s14 + $0x48] sm:$0xff]  }
  0x31   : > { %v440_v15 = vsel %vm404_vm1, %v2256_v59, %v439_v6  ;;  %v464_v17 = vsel %vm404_vm1, %v2271_v8, %v463_v9  ;;  %v691_v21 = vrot.slane %v689_v13, 1  ;;  %v650_v25 = vunpack.c.l.b16 %v1628_v14  ;;  %v253_v52 = vld [vmem:[%s2206_s14 + $0x14] sm:$0x1] }
  0x32   : > { %758 = vrot.lane.b32.xlu1 %v673_v63, %s2097_s10  ;;  %v694_v22 = vshll.u32 %v656_v12, 16  ;;  %v550_v26 = vsel %vm541_vm0, %v548_v18, %v549_v19  ;;  %v1770_v27 = vor.u32 %v1769_v24, %v1768_v23  ;;  %v713_v31 = vshll.u32 %v1616_v4, 16  ;;  %v1789_v6 = vld [vmem:[%s2206_s14 + $0x30] sm:$0xf0]  ;;  %v1909_v18 = vld [vmem:[%s2206_s14 + $0xc] sm:$0xe] }
  0x33   : > { %v692_v28 = vor.u32 %v691_v21, %v687_v20  ;;  %v658_v30 = vpack.c.b16 %v650_v25, %v650_v25  ;;  %v555_v35 = vrot.slane %v2249_v50, 1  ;;  %v904_v36 = vunpack.c.l.b16 %v1660_v33  ;;  %v1792_v19 = vld [vmem:[%s2206_s14 + $0x48] sm:$0xf0]  ;;  %v1793_v20 = vld [vmem:[%s2206_s14 + $0x48] sm:$0xe] }
  0x34   : > { %v696_v29 = vrot.slane %v694_v22, 1  ;;  %v554_v34 = vrot.slane %v1770_v27, 1  ;;  %v711_v38 = vshrl.u32 %v1616_v4, 16  ;;  %v715_v39 = vrot.slane %v713_v31, 1  ;;  %v258_v21 = vld [vmem:[%s2206_s14 + $0x50] sm:$0x1] }
  0x35   : > { %v718_v41 = vshll.u32 %v658_v30, 16  ;;  %v1904_v47 = vor.u32 %v1903_v32, %v2245_v44  ;;  %v912_v50 = vpack.c.b16 %v904_v36, %v904_v36  ;;  %v805_v54 = vrot.slane %v656_v12, 1  ;;  %v1771_v36 = vld [vmem:[%s2206_s14 + $0x48] sm:$0xf0] }
  0x36   : > { %v697_v37 = vsel %vm404_vm1, %v692_v28, %v696_v29  ;;  %v556_v46 = vsel %vm541_vm0, %v554_v34, %v555_v35  ;;  %v716_v48 = vor.u32 %v715_v39, %v711_v38  ;;  %v389_v56 = vunpack.c.l.b16 %v253_v52  ;;  %v1625_v39 = vld [vmem:[%s2206_s14 + $0x20] sm:$0x1]  ;;  %v1911_v52 = vld [vmem:[%s2206_s14 + $0x54] sm:$0xf0] }
  0x37   : > { %v720_v49 = vrot.slane %v718_v41, 1  ;;  %v804_v53 = vrot.slane %v1904_v47, 1  ;;  %v1907_v57 = vor.u32 %v1906_v51, %v2266_v5  ;;  %v420_v61 = vshll.u32 %v2292_v42, 16  ;;  %v1620_v51 = vld [vmem:[%s2206_s14 + $0x54] sm:$0xff]  }
  0x38   : > { %1014 = vrot.lane.b32.xlu0 %v929_v7, %s2098_s11  ;;  %505 = vrot.lane.b32.xlu2 %v440_v15, %s2095_s8  ;;  %v397_v60 = vpack.c.b16 %v389_v56, %v389_v56  ;;  %v811_v0 = vrot.slane %v658_v30, 1  ;;  %v418_v1 = vshrl.u32 %v2292_v42, 16  ;;  %v1790_v7 = vld [vmem:[%s2206_s14 + $0x30] sm:$0xe]  ;;  %v906_v9 = vunpack.c.l.b16 %v1662_v62 }
  0x39   : > { %v721_v55 = vsel %vm404_vm1, %v716_v48, %v720_v49  ;;  %v806_v44 = vsel %vm541_vm0, %v804_v53, %v805_v54  ;;  %v810_v63 = vrot.slane %v1907_v57, 1  ;;  %v969_v10 = vshll.u32 %v2315_v2, 16  ;;  %v1775_v57 = vld [vmem:[%s2206_s14 + $0x18] sm:$0xe] }
  0x3a   : > { %509 = vrot.lane.b32.xlu1 %v464_v17, %s2095_s8  ;;  %v425_v5 = vshll.u32 %v397_v60, 16  ;;  %v1791_v13 = vor.u32 %v1790_v7, %v1789_v6  ;;  %v914_v17 = vpack.c.b16 %v906_v9, %v906_v9  ;;  %v967_v22 = vshrl.u32 %v2315_v2, 16 }
  0x3b   : > { %v812_v12 = vsel %vm541_vm0, %v810_v63, %v811_v0  ;;  %v971_v23 = vrot.slane %v969_v10, 1  ;;  %v1794_v28 = vor.u32 %v1793_v20, %v1792_v19  ;;  %v394_v29 = vunpack.c.l.b16 %v258_v21 }
  0x3c   : > { %v427_v15 = vrot.slane %v425_v5, 1  ;;  %v974_v24 = vshll.u32 %v914_v17, 16  ;;  %v1060_v25 = vrot.slane %v1791_v13, 1  ;;  %v1910_v33 = vor.u32 %v1909_v18, %v2295_v45 }
  0x3d   : > { %v2335_v30 = vor.u32 %v971_v23, %v967_v22  ;;  %v1066_v34 = vrot.slane %v1794_v28, 1  ;;  %v1067_v35 = vrot.slane %v914_v17, 1  ;;  %v402_v38 = vpack.c.b16 %v394_v29, %v394_v29  ;;  %v1915_v22 = vld [vmem:[%s2206_s14 + $0x24] sm:$0xe]  ;;  %v255_v28 = vld [vmem:[%s2206_s14 + $0x2c] sm:$0x1] }
  0x3e   : > { %v976_v31 = vrot.slane %v974_v24, 1  ;;  %v545_v47 = vrot.slane %v1910_v33, 1  ;;  %v546_v48 = vrot.slane %v397_v60, 1  ;;  %v737_v5 = vshll.u32 %v1620_v51, 16  ;;  %v2373_v23 = vld [vmem:[%s2206_s14 + $0x24] sm:$0xff]  }
  0x3f   : > { %v1068_v49 = vsel %vm541_vm0, %v1066_v34, %v1067_v35  ;;  %v1917_v24 = vld [vmem:[%s2206_s14 + $0x24] sm:$0xf0] }
  0x40   : > { %570 = vrot.lane.b32.xlu0 %v550_v26, %s2766_s5  ;;  %626 = vrot.lane.b32.xlu2 %v2242_v43, %s2092_s30  ;;  %v950_v43 = vshll.u32 %v912_v50, 16  ;;  %v1061_v26 = vrot.slane %v912_v50, 1  ;;  %v977_v41 = vsel %vm404_vm1, %v2335_v30, %v976_v31  ;;  %v647_v50 = vunpack.c.l.b16 %v1625_v39  ;;  %v1664_v33 = vld [vmem:[%s2206_s14 + $0x68] sm:$0x1] }
  0x41   : > { %v547_v54 = vsel %vm541_vm0, %v545_v47, %v546_v48  ;;  %v908_v39 = vunpack.c.l.b16 %v1664_v33  ;;  %v2385_v47 = vld [vmem:[%s2206_s14 + $0x60] sm:$0xff]   ;;  %v444_v48 = vshll.u32 %v2373_v23, 16 }
  0x42   : > { %762 = vrot.lane.b32.xlu1 %v697_v37, %s2097_s10  ;;  %v952_v58 = vrot.slane %v950_v43, 1  ;;  %v1062_v32 = vsel %vm541_vm0, %v1060_v25, %v1061_v26  ;;  %v1772_v37 = vld [vmem:[%s2206_s14 + $0x48] sm:$0xe]  ;;  %v561_v43 = vrot.slane %v402_v38, 1  ;;  %v655_v56 = vpack.c.b16 %v647_v50, %v647_v50 }
  0x43   : > { %v1773_v45 = vor.u32 %v1772_v37, %v1771_v36  ;;  %v391_v37 = vunpack.c.l.b16 %v255_v28 }
  0x44   : > { %v953_v3 = vsel %vm404_vm1, %v2271_v8, %v952_v58  ;;  %v1630_v58 = vld [vmem:[%s2206_s14 + $0x5c] sm:$0x1]  ;;  %v802_v9 = vrot.slane %v655_v56, 1 }
  0x45   : > { %v652_v0 = vunpack.c.l.b16 %v1630_v58  ;;  %v446_v58 = vrot.slane %v444_v48, 1 }
  0x47   : > { %v660_v10 = vpack.c.b16 %v652_v0, %v652_v0  ;;  %v257_v0 = vld [vmem:[%s2206_s14 + $0x44] sm:$0x1] }
  0x48   : > { %574 = vrot.lane.b32.xlu0 %v556_v46, %s2766_s5  ;;  %630 = vrot.lane.b32.xlu2 %v1616_v4, %s2092_s30  ;;  %v422_v4 = vrot.slane %v420_v61, 1  ;;  %v485_v46 = vshll.u32 %v402_v38, 16  ;;  %v682_v61 = vshll.u32 %v655_v56, 16  ;;  %v1918_v38 = vld [vmem:[%s2206_s14 + $0x24] sm:$0xe] }
  0x49   : > { %v742_v17 = vshll.u32 %v660_v10, 16 }
  0x4a   : > { %766 = vrot.lane.b32.xlu1 %v721_v55, %s2097_s10  ;;  %v423_v14 = vor.u32 %v422_v4, %v418_v1  ;;  %v487_v53 = vrot.slane %v485_v46, 1  ;;  %v560_v55 = vrot.slane %v1773_v45, 1  ;;  %v1644_v1 = vld [vmem:[%s2206_s14 + $0x24] sm:$0xff]   ;;  %v1912_v4 = vld [vmem:[%s2206_s14 + $0x54] sm:$0xe]  ;;  %v684_v6 = vrot.slane %v682_v61, 1 }
  0x4b   : > { %v1913_v20 = vor.u32 %v1912_v4, %v1911_v52  ;;  %v933_v21 = vshll.u32 %v1644_v1, 16  ;;  %v744_v25 = vrot.slane %v742_v17, 1  ;;  %v931_v29 = vshrl.u32 %v1644_v1, 16  ;;  %v1234_v45 = vld [vmem:[%s2760_s1 + $0x10] sm:$0x3] }
  0x4c   : > { %v428_v27 = vsel %vm404_vm1, %v423_v14, %v427_v15  ;;  %v488_v60 = vsel %vm404_vm1, %v2335_v30, %v487_v53  ;;  %v562_v62 = vsel %vm541_vm0, %v560_v55, %v561_v43  ;;  %v685_v13 = vsel %vm404_vm1, %v2256_v59, %v684_v6  ;;  %v2393_v53 = vld [vmem:[%s2206_s14 + $0x3c] sm:$0xff]  }
  0x4d   : > { %v735_v14 = vshrl.u32 %v1620_v51, 16  ;;  %v739_v15 = vrot.slane %v737_v5, 1  ;;  %v816_v26 = vrot.slane %v1913_v20, 1  ;;  %v935_v31 = vrot.slane %v933_v21, 1  ;;  %v1700_v21 = vld [vmem:[%s2760_s1] sm:$0xff] }
  0x4e   : > { %v399_v52 = vpack.c.b16 %v391_v37, %v391_v37  ;;  %v993_v55 = vshll.u32 %v2385_v47, 16  ;;  %v2399_v43 = vpack.c.b16 %v908_v39, %v908_v39 }
  0x50   : > { %826 = vrot.lane.b32.xlu0 %v806_v44, %s2096_s9  ;;  %882 = vrot.lane.b32.xlu2 %v2238_v40, %s2091_s27  ;;  %v1774_v44 = vld [vmem:[%s2206_s14 + $0x18] sm:$0xf0]  ;;  %v998_v5 = vshll.u32 %v2399_v43, 16  ;;  %v1073_v28 = vrot.slane %v2399_v43, 1 }
  0x51   : > { %v1776_v63 = vor.u32 %v1775_v57, %v1774_v44  ;;  %v442_v57 = vshrl.u32 %v2373_v23, 16  ;;  %v2450_v43 = vld [vmem:[%s2206_s14 + $0x3c] sm:$0xff]  }
  0x52   : > { %1018 = vrot.lane.b32.xlu1 %v953_v3, %s2098_s11  ;;  %v1914_v3 = vld [vmem:[%s2206_s14 + $0x24] sm:$0xf0] }
  0x53   : > { %v801_v7 = vrot.slane %v1776_v63, 1  ;;  %v1916_v36 = vor.u32 %v1915_v22, %v1914_v3  ;;  %v1919_v63 = vor.u32 %v1918_v38, %v1917_v24  ;;  %v991_v3 = vshrl.u32 %v2385_v47, 16 }
  0x54   : > { %v447_v6 = vor.u32 %v446_v58, %v442_v57  ;;  %v468_v24 = vshll.u32 %v2393_v53, 16 }
  0x55   : > { %v803_v19 = vsel %vm541_vm0, %v801_v7, %v802_v9  ;;  %v1057_v50 = vrot.slane %v1916_v36, 1  ;;  %v1701_v9 = vld [vmem:[%s2760_s1 + $0x8] sm:$0xff] }
  0x58   : > { %830 = vrot.lane.b32.xlu0 %v812_v12, %s2096_s9  ;;  %886 = vrot.lane.b32.xlu2 %v2315_v2, %s2091_s27  ;;  %v1659_v12 = vld [vmem:[%s2206_s14 + $0x2c] sm:$0x1] }
  0x59   : > { %v903_v18 = vunpack.c.l.b16 %v1659_v12  ;;  %v1795_v12 = vld [vmem:[%s2206_s14 + $0x60] sm:$0xf0] }
  0x5a   : > { %503 = vrot.lane.b32.xlu1 %v428_v27, %s2095_s8  ;;  %v817_v27 = vrot.slane %v660_v10, 1  ;;  %v393_v10 = vunpack.c.l.b16 %v257_v0  ;;  %v2459_v0 = vld [vmem:[%s2206_s14 + $0x54] sm:$0xff]  }
  0x5b   : > { %v911_v59 = vpack.c.b16 %v903_v18, %v903_v18  ;;  %v1000_v18 = vrot.slane %v998_v5, 1 }
  0x5c   : > { %v818_v35 = vsel %vm541_vm0, %v816_v26, %v817_v27  ;;  %v401_v22 = vpack.c.b16 %v393_v10, %v393_v10 }
  0x60   : > { %1082 = vrot.lane.b32.xlu0 %v1062_v32, %s2094_s6  ;;  %1022 = vrot.lane.b32.xlu2 %v977_v41, %s2098_s11  ;;  %v938_v32 = vshll.u32 %v911_v59, 16  ;;  %v936_v41 = vor.u32 %v935_v31, %v931_v29  ;;  %v466_v29 = vshrl.u32 %v2393_v53, 16  ;;  %v470_v31 = vrot.slane %v468_v24, 1 }
  0x62   : > { %1086 = vrot.lane.b32.xlu1 %v1068_v49, %s2094_s6  ;;  %v940_v46 = vrot.slane %v938_v32, 1  ;;  %v1244_v49 = vunpack.c.l.b16 %v1234_v45  ;;  %v473_v32 = vshll.u32 %v401_v22, 16  ;;  %v471_v38 = vor.u32 %v470_v31, %v466_v29 }
  0x63   : > { %v558_v45 = vrot.slane %v401_v22, 1  ;;  %v1663_v22 = vld [vmem:[%s2206_s14 + $0x5c] sm:$0x1] }
  0x64   : > { %v941_v56 = vsel %vm404_vm1, %v936_v41, %v940_v46  ;;  %v1247_v44 = vpack.c.b16 %v1244_v49, %v1244_v49  ;;  %v475_v39 = vrot.slane %v473_v32, 1 }
  0x66   : > { %v1269_v61 = vsel %vm1267_vm2, %v1247_v44, 0  ;;  %v476_v49 = vsel %vm404_vm1, %v471_v38, %v475_v39  ;;  %v259_v38 = vld [vmem:[%s2206_s14 + $0x5c] sm:$0x1] }
  0x67   : > { %1276 = vmatpush.bf16.msra.mxu0 %v1269_v61  ;;  %1798 = vmatpush.bf16.msra.mxu1 %v1269_v61 }
  0x68   : > { %568 = vrot.lane.b32.xlu0 %v547_v54, %s2766_s5  ;;  %513 = vrot.lane.b32.xlu2 %v488_v60, %s2095_s8  ;;  %v2396_v54 = vld [vmem:[%s2206_s14 + $0x3c] sm:$0xf0]  ;;  %v449_v60 = vshll.u32 %v399_v52, 16 }
  0x69   : > { %1799 = vmatpush.bf16.msra.mxu2 %v1269_v61  ;;  %1800 = vmatpush.bf16.msra.mxu3 %v1269_v61 }
  0x6a   : > { %578 = vrot.lane.b32.xlu1 %v562_v62, %s2766_s5  ;;  %v451_v7 = vrot.slane %v449_v60, 1 }
  0x6b   : > { %1277 = vmatpush.bf16.msra.mxu0 %v1701_v9  ;;  %1801 = vmatpush.bf16.msra.mxu1 %v1701_v9 }
  0x6d   : > { %1802 = vmatpush.bf16.msra.mxu2 %v1701_v9  ;;  %1803 = vmatpush.bf16.msra.mxu3 %v1701_v9 }
  0x6f   : > { %1278 = vmatpush.bf16.msra.mxu0 %v1700_v21  ;;  %1804 = vmatpush.bf16.msra.mxu1 %v1700_v21 }
  0x70   : > { %624 = vrot.lane.b32.xlu0 %v2224_v16, %s2092_s30  ;;  %760 = vrot.lane.b32.xlu2 %v685_v13, %s2097_s10  ;;  %v740_v16 = vor.u32 %v739_v15, %v735_v14  ;;  %v1796_v13 = vld [vmem:[%s2206_s14 + $0x60] sm:$0xe]  ;;  %v551_v14 = vrot.slane %v1919_v63, 1  ;;  %v552_v15 = vrot.slane %v399_v52, 1  ;;  %v1777_v52 = vld [vmem:[%s2206_s14 + $0x30] sm:$0xf0] }
  0x71   : > { %v1797_v20 = vor.u32 %v1796_v13, %v1795_v12  ;;  %1805 = vmatpush.bf16.msra.mxu2 %v1700_v21  ;;  %1806 = vmatpush.bf16.msra.mxu3 %v1700_v21 }
  0x72   : > { %824 = vrot.lane.b32.xlu1 %v803_v19, %s2096_s9  ;;  %v745_v34 = vsel %vm404_vm1, %v740_v16, %v744_v25  ;;  %v452_v19 = vsel %vm404_vm1, %v447_v6, %v451_v7  ;;  %v1921_v16 = vld [vmem:[%s2206_s14 + $0x3c] sm:$0xe]  ;;  %v553_v25 = vsel %vm541_vm0, %v551_v14, %v552_v15  ;;  %v1780_v6 = vld [vmem:[%s2206_s14 + $0x48] sm:$0xf0]  ;;  %v1781_v7 = vld [vmem:[%s2206_s14 + $0x48] sm:$0xe] }
  0x73   : > { %v1072_v27 = vrot.slane %v1797_v20, 1  ;;  %v1922_v37 = vor.u32 %v1921_v16, %v2396_v54  ;;  %v1778_v54 = vld [vmem:[%s2206_s14 + $0x30] sm:$0xe]  ;;  %v1782_v15 = vor.u32 %v1781_v7, %v1780_v6 }
  0x74   : > { %v1779_v58 = vor.u32 %v1778_v54, %v1777_v52 }
  0x75   : > { %v1074_v36 = vsel %vm541_vm0, %v1072_v27, %v1073_v28  ;;  %v557_v48 = vrot.slane %v1922_v37, 1  ;;  %v813_v27 = vrot.slane %v1782_v15, 1  ;;  %v981_v37 = vshll.u32 %v2459_v0, 16 }
  0x77   : > { %v559_v57 = vsel %vm541_vm0, %v557_v48, %v558_v45 }
  0x78   : > { %634 = vrot.lane.b32.xlu0 %v1620_v51, %s2092_s30  ;;  %770 = vrot.lane.b32.xlu2 %v745_v34, %s2097_s10  ;;  %v1058_v51 = vrot.slane %v911_v59, 1  ;;  %v1627_v59 = vld [vmem:[%s2206_s14 + $0x38] sm:$0x1] }
  0x79   : > { %v649_v34 = vunpack.c.l.b16 %v1627_v59  ;;  %v2487_v59 = vld [vmem:[%s2206_s14 + $0x54] sm:$0xff]  }
  0x7a   : > { %834 = vrot.lane.b32.xlu1 %v818_v35, %s2096_s9  ;;  %v1059_v62 = vsel %vm541_vm0, %v1057_v50, %v1058_v51  ;;  %v1629_v35 = vld [vmem:[%s2206_s14 + $0x50] sm:$0x1] }
  0x7b   : > { %v657_v41 = vpack.c.b16 %v649_v34, %v649_v34  ;;  %v651_v46 = vunpack.c.l.b16 %v1629_v35  ;;  %v907_v34 = vunpack.c.l.b16 %v1663_v22  ;;  %v1932_v22 = vld [vmem:[%s2206_s14 + $0x6c] sm:$0xf0] }
  0x7d   : > { %v706_v50 = vshll.u32 %v657_v41, 16  ;;  %v659_v44 = vpack.c.b16 %v651_v46, %v651_v46  ;;  %v808_v5 = vrot.slane %v657_v41, 1 }
  0x7e   : > { %v2407_v4 = vpop.permute.xlu2 %878 }
  0x7f   : > { %v708_v60 = vrot.slane %v706_v50, 1  ;;  %v730_v63 = vshll.u32 %v659_v44, 16  ;;  %v814_v29 = vrot.slane %v659_v44, 1  ;;  %v915_v50 = vpack.c.b16 %v907_v34, %v907_v34 }
  0x80   : > { %880 = vrot.lane.b32.xlu0 %v1644_v1, %s2091_s27  ;;  %1016 = vrot.lane.b32.xlu2 %v941_v56, %s2098_s11  ;;  %v995_v1 = vrot.slane %v993_v55, 1  ;;  %v2453_v56 = vld [vmem:[%s2206_s14 + $0x3c] sm:$0xf0] }
  0x81   : > { %v709_v9 = vsel %vm404_vm1, %v2271_v8, %v708_v60  ;;  %v732_v14 = vrot.slane %v730_v63, 1  ;;  %v1924_v8 = vld [vmem:[%s2206_s14 + $0x3c] sm:$0xe]  ;;  %v815_v41 = vsel %vm541_vm0, %v813_v27, %v814_v29  ;;  %v979_v60 = vshrl.u32 %v2459_v0, 16 }
  0x82   : > { %1080 = vrot.lane.b32.xlu1 %v1059_v62, %s2094_s6  ;;  %v2417_v17 = vor.u32 %v995_v1, %v991_v3  ;;  %v1661_v62 = vld [vmem:[%s2206_s14 + $0x44] sm:$0x1]  ;;  %v2462_v3 = vld [vmem:[%s2206_s14 + $0x54] sm:$0xf0]  ;;  %v807_v1 = vrot.slane %v1779_v58, 1  ;;  %v1925_v46 = vor.u32 %v1924_v8, %v2453_v56  ;;  %v492_v58 = vshll.u32 %v2487_v59, 16 }
  0x83   : > { %v905_v12 = vunpack.c.l.b16 %v1661_v62  ;;  %v733_v16 = vsel %vm404_vm1, %v2335_v30, %v732_v14  ;;  %v986_v62 = vshll.u32 %v915_v50, 16 }
  0x84   : > { %v1001_v26 = vsel %vm404_vm1, %v2417_v17, %v1000_v18  ;;  %v809_v18 = vsel %vm541_vm0, %v807_v1, %v808_v5  ;;  %v1070_v1 = vrot.slane %v915_v50, 1  ;;  %v1930_v5 = vld [vmem:[%s2206_s14 + $0x54] sm:$0xe] }
  0x85   : > { %v2476_v20 = vpack.c.b16 %v905_v12, %v905_v12 }
  0x87   : > { %v962_v30 = vshll.u32 %v2476_v20, 16 }
  0x88   : > { %890 = vrot.lane.b32.xlu0 %v2385_v47, %s2091_s27  ;;  %507 = vrot.lane.b32.xlu2 %v452_v19, %s2095_s8  ;;  %v957_v19 = vshll.u32 %v2450_v43, 16 }
  0x8a   : > { %572 = vrot.lane.b32.xlu1 %v553_v25, %s2766_s5  ;;  %v2435_v33 = vpop.permute.xlu2 %822  ;;  %v1927_v25 = vld [vmem:[%s2206_s14 + $0x54] sm:$0xe]  ;;  %v959_v31 = vrot.slane %v957_v19, 1 }
  0x90   : > { %1026 = vrot.lane.b32.xlu0 %v1001_v26, %s2098_s11  ;;  %1090 = vrot.lane.b32.xlu2 %v1074_v36, %s2094_s6  ;;  %v2490_v26 = vld [vmem:[%s2206_s14 + $0x54] sm:$0xf0] }
  0x91   : > { %v1931_v27 = vor.u32 %v1930_v5, %v2490_v26 }
  0x92   : > { %628 = vrot.lane.b32.xlu1 %v2238_v40, %s2092_s30  ;;  %v2445_v51 = vpop.permute.xlu2 %505 }
  0x93   : > { %v623_v55 = vpop.permute.xlu1 %622 }
  0x98   : > { %511 = vrot.lane.b32.xlu0 %v476_v49, %s2095_s8  ;;  %576 = vrot.lane.b32.xlu2 %v559_v57, %s2766_s5  ;;  %v964_v49 = vrot.slane %v962_v30, 1  ;;  %v1064_v57 = vrot.slane %v2476_v20, 1 }
  0x9a   : > { %v567_v61 = vpop.permute.xlu0 %566  ;;  %632 = vrot.lane.b32.xlu1 %v2315_v2, %s2092_s30  ;;  %v2471_v10 = vpop.permute.xlu2 %626 }
  0x9c   : > { %v1079_v13 = vpop.permute.xlu1 %1078 }
  0xa0   : > { %764 = vrot.lane.b32.xlu0 %v709_v9, %s2097_s10  ;;  %828 = vrot.lane.b32.xlu2 %v809_v18, %s2096_s9  ;;  %v1631_v9 = vld [vmem:[%s2206_s14 + $0x68] sm:$0x1]  ;;  %v988_v18 = vrot.slane %v986_v62, 1  ;;  %v1898_v62 = vld [vmem:[%s2206_s14 + $0x18] sm:$0xff]  }
  0xa1   : > { %v653_v8 = vunpack.c.l.b16 %v1631_v9 }
  0xa2   : > { %v502_v21 = vpop.permute.xlu0 %501  ;;  %884 = vrot.lane.b32.xlu1 %v2450_v43, %s2091_s27  ;;  %v2497_v32 = vpop.permute.xlu2 %630 }
  0xa3   : > { %v1096_v24 = vsel %vm1094_vm3, %v2219_v11, %v502_v21  ;;  %v955_v11 = vshrl.u32 %v2450_v43, 16  ;;  %v395_v43 = vunpack.c.l.b16 %v259_v38  ;;  %v1656_v21 = vld [vmem:[%s2206_s14 + $0x6c] sm:$0xff]   ;;  %v661_v29 = vpack.c.b16 %v653_v8, %v653_v8  ;;  %v1783_v38 = vld [vmem:[%s2206_s14 + $0x60] sm:$0xf0] }
  0xa4   : > { %v1113_v28 = vsel %vm1111_vm4, %v1096_v24, %v567_v61  ;;  %v759_v35 = vpop.permute.xlu1 %758  ;;  %v983_v61 = vrot.slane %v981_v37, 1  ;;  %v1005_v26 = vshll.u32 %v1656_v21, 16 }
  0xa5   : > { %v1130_v36 = vsel %vm1128_vm5, %v1113_v28, %v623_v55  ;;  %v960_v45 = vor.u32 %v959_v31, %v955_v11  ;;  %v1928_v55 = vor.u32 %v1927_v25, %v2462_v3  ;;  %v403_v6 = vpack.c.b16 %v395_v43, %v395_v43  ;;  %v1665_v31 = vld [vmem:[%s2206_s14 + $0x74] sm:$0x1] }
  0xa6   : > { %v1147_v39 = vsel %vm1145_vm6, %v1130_v36, %v759_v35  ;;  %v984_v15 = vor.u32 %v983_v61, %v979_v60  ;;  %v754_v34 = vshll.u32 %v661_v29, 16  ;;  %v563_v35 = vrot.slane %v1931_v27, 1 }
  0xa7   : > { %v1164_v48 = vsel %vm1162_vm7, %v1147_v39, %v2435_v33  ;;  %v1063_v33 = vrot.slane %v1925_v46, 1  ;;  %v1069_v3 = vrot.slane %v1928_v55, 1  ;;  %v497_v14 = vshll.u32 %v403_v6, 16  ;;  %v1784_v39 = vld [vmem:[%s2206_s14 + $0x60] sm:$0xe] }
  0xa8   : > { %768 = vrot.lane.b32.xlu0 %v733_v16, %s2097_s10  ;;  %v1181_v52 = vsel %vm1179_vm8, %v1164_v48, %v2407_v4  ;;  %832 = vrot.lane.b32.xlu2 %v815_v41, %s2096_s9  ;;  %v965_v4 = vsel %vm404_vm1, %v960_v45, %v964_v49  ;;  %v989_v25 = vsel %vm404_vm1, %v984_v15, %v988_v18  ;;  %v564_v36 = vrot.slane %v403_v6, 1  ;;  %v1933_v49 = vld [vmem:[%s2206_s14 + $0x6c] sm:$0xe]  ;;  %s2616_s14 = sand.u32 1, %s2065_s16  }
  0xa9   : > { %v1065_v12 = vsel %vm541_vm0, %v1063_v33, %v1064_v57  ;;  %v1071_v20 = vsel %vm541_vm0, %v1069_v3, %v1070_v1  ;;  %v499_v16 = vrot.slane %v497_v14, 1  ;;  %v909_v41 = vunpack.c.l.b16 %v1665_v31 }
  0xaa   : > { %v1015_v54 = vpop.permute.xlu0 %1014  ;;  %888 = vrot.lane.b32.xlu1 %v2459_v0, %s2091_s27  ;;  %v2521_v63 = vpop.permute.xlu2 %882  ;;  %v494_v0 = vrot.slane %v492_v58, 1  ;;  %v756_v46 = vrot.slane %v754_v34, 1  ;;  %v565_v48 = vsel %vm541_vm0, %v563_v35, %v564_v36  ;;  %v1785_v45 = vor.u32 %v1784_v39, %v1783_v38 }
  0xab   : > { %v1198_v44 = vsel %vm1196_vm9, %v1181_v52, %v1015_v54  ;;  %v917_v50 = vpack.c.b16 %v909_v41, %v909_v41  ;;  %v1003_v43 = vshrl.u32 %v1656_v21, 16  ;;  %v820_v57 = vrot.slane %v661_v29, 1 }
  0xac   : > { %v1215_v56 = vsel %vm1213_vm10, %v1198_v44, %v1079_v13  ;;  %v2524_v7 = vpop.permute.xlu1 %509  ;;  %v490_v13 = vshrl.u32 %v2487_v59, 16  ;;  %v757_v55 = vsel %vm404_vm1, %v2417_v17, %v756_v46  ;;  %v1007_v44 = vrot.slane %v1005_v26, 1 }
  0xad   : > { %1682 = vmatmul.msk.bf16.vlgmr.msra.gmra.mxu0 %vm1250_vm11, %v1215_v56  ;;  %v1010_v56 = vshll.u32 %v917_v50, 16  ;;  %v819_v33 = vrot.slane %v1785_v45, 1  ;;  %v1934_v61 = vor.u32 %v1933_v49, %v1932_v22  ;;  %v1100_v3 = vsel %vm1094_vm3, %v1898_v62, %v2445_v51 }
  0xae   : > { %v495_v24 = vor.u32 %v494_v0, %v490_v13  ;;  %v1104_v6 = vsel %vm1094_vm3, %v2238_v40, %v2524_v7  ;;  %v1076_v13 = vrot.slane %v917_v50, 1 }
  0xaf   : > { %v821_v60 = vsel %vm541_vm0, %v819_v33, %v820_v57 }
  0xb0   : > { %1020 = vrot.lane.b32.xlu0 %v965_v4, %s2098_s11  ;;  %1084 = vrot.lane.b32.xlu2 %v1065_v12, %s2094_s6  ;;  %v500_v30 = vsel %vm404_vm1, %v495_v24, %v499_v16  ;;  %v1012_v4 = vrot.slane %v1010_v56, 1  ;;  %v1075_v12 = vrot.slane %v1934_v61, 1 }
  0xb2   : > { %v571_v19 = vpop.permute.xlu0 %570  ;;  %1088 = vrot.lane.b32.xlu1 %v1071_v20, %s2094_s6  ;;  %v2537_v28 = vpop.permute.xlu2 %886  ;;  %v1077_v18 = vsel %vm541_vm0, %v1075_v12, %v1076_v13 }
  0xb3   : > { %v1117_v9 = vsel %vm1111_vm4, %v1100_v3, %v571_v19 }
  0xb4   : > { %v763_v11 = vpop.permute.xlu1 %762  ;;  %v1134_v51 = vsel %vm1128_vm5, %v1117_v9, %v2471_v10 }
  0xb5   : > { %v1151_v15 = vsel %vm1145_vm6, %v1134_v51, %v763_v11 }
  0xb8   : > { %1024 = vrot.lane.b32.xlu0 %v989_v25, %s2098_s11  ;;  %515 = vrot.lane.b32.xlu2 %v500_v30, %s2095_s8  ;;  %s1693_s8 = sshll.u32 %s2077_s19, 5 }
  0xba   : > { %v575_v37 = vpop.permute.xlu0 %574  ;;  %636 = vrot.lane.b32.xlu1 %v2385_v47, %s2092_s30  ;;  %v1023_v54 = vpop.permute.xlu2 %1022  ;;  %v1008_v47 = vor.u32 %v1007_v44, %v1003_v43 }
  0xbb   : > { %v1121_v14 = vsel %vm1111_vm4, %v1104_v6, %v575_v37 }
  0xbc   : > { %v767_v52 = vpop.permute.xlu1 %766  ;;  %v1013_v5 = vsel %vm404_vm1, %v1008_v47, %v1012_v4  ;;  %v1138_v40 = vsel %vm1128_vm5, %v1121_v14, %v2497_v32 }
  0xbd   : > { %v1155_v19 = vsel %vm1145_vm6, %v1138_v40, %v767_v52 }
  0xc0   : > { %580 = vrot.lane.b32.xlu0 %v565_v48, %s2766_s5  ;;  %772 = vrot.lane.b32.xlu2 %v757_v55, %s2097_s10 }
  0xc2   : > { %v827_v58 = vpop.permute.xlu0 %826  ;;  %892 = vrot.lane.b32.xlu1 %v1656_v21, %s2091_s27  ;;  %v514_v1 = vpop.permute.xlu2 %513  ;;  %s1601_s27 = sshll.u32 %s2616_s14, 7 }
  0xc3   : > { %v1168_v20 = vsel %vm1162_vm7, %v1151_v15, %v827_v58  ;;  %s2627_s30 = scalar_lea.vmem [#allocation2], %s1601_s27 }
  0xc4   : > { %v1019_v17 = vpop.permute.xlu1 %1018  ;;  %v1185_v8 = vsel %vm1179_vm8, %v1168_v20, %v2521_v63  ;;  %s1420_s27 = sshll.u32 %s2627_s30, 4  ;;  %s1421_s27 = int_to_ptr.vmem [resolvable:$true] %s1420_s27 }
  0xc5   : > { %v1202_v22 = vsel %vm1196_vm9, %v1185_v8, %v1019_v17 }
  0xc8   : > { %836 = vrot.lane.b32.xlu0 %v821_v60, %s2096_s9  ;;  %1028 = vrot.lane.b32.xlu2 %v1013_v5, %s2098_s11 }
  0xca   : > { %v831_v0 = vpop.permute.xlu0 %830  ;;  %v761_v21 = vpop.permute.xlu2 %760 }
  0xcb   : > { %v1172_v10 = vsel %vm1162_vm7, %v1155_v19, %v831_v0 }
  0xcc   : > { %v504_v7 = vpop.permute.xlu1 %503  ;;  %v1189_v25 = vsel %vm1179_vm8, %v1172_v10, %v2537_v28 }
  0xcd   : > { %v1206_v32 = vsel %vm1196_vm9, %v1189_v25, %v1023_v54  ;;  %v1098_v37 = vsel %vm1094_vm3, %v2292_v42, %v504_v7  ;;  %v1108_v42 = vsel %vm1094_vm3, %v2315_v2, %v514_v1 }
  0xd0   : > { %1092 = vrot.lane.b32.xlu0 %v1077_v18, %s2094_s6  ;;  %s1702_s6 = sshll.u32 %s2073_s18, 4 }
  0xd1   : > { %s1417_s9 = sadd.s32 %s1702_s6, %s1693_s8  ;;  %s1695_s6 = sshll.u32 %s2077_s19, 1 }
  0xd2   : > { %v1083_v24 = vpop.permute.xlu0 %1082  ;;  %v771_v11 = vpop.permute.xlu2 %770  ;;  %s1694_s10 = sshll.u32 %s1417_s9, 3  ;;  %s1397_s8 = scalar_lea.sflag [#allocation3], %s2616_s14 }
  0xd3   : > { %v1219_v16 = vsel %vm1213_vm10, %v1202_v22, %v1083_v24  ;;  %s1419_s13 = scalar_lea.hbm %s2761_s2, %s1694_s10 }
  0xd4   : > { %1684 = vmatmul.msk.bf16.vlgmr.msra.gmra.mxu1 %vm1250_vm11, %v1219_v16  ;;  %v1087_v27 = vpop.permute.xlu1 %1086  ;;  %s1422_s24 = sshll.u32 %s1419_s13, 4  ;;  %s1955_s13 = scalar_lea.hbm %s2761_s2, 512  ;;  %s1423_s24 = int_to_ptr.hbm [resolvable:$true] %s1422_s24 }
  0xd5   : > { %v1223_v29 = vsel %vm1213_vm10, %v1206_v32, %v1087_v27  ;;  %s1949_s9 = sshra.s32 %s1423_s24, 4  ;;  %s1950_s9 = int_to_ptr.hbm [resolvable:$true] %s1949_s9 }
  0xd6   : > { %1686 = vmatmul.msk.bf16.vlgmr.msra.gmra.mxu2 %vm1250_vm11, %v1223_v29  ;;  %s1951_s10 = scalar_lea.hbm %s1950_s9, 128  ;;  %p1956_p2 = scmp.lt.s32.totalorder %s1950_s9, %s2761_s2 }
  0xd7   : > { %p1952_p13 = scmp.ne.s32.totalorder %s1950_s9, %s1951_s10  ;;  %p1957_p4 = scmp.lt.s32.totalorder %s1955_s13, %s1951_s10 }
  0xd9   : > { %p1953_p0 = pnand %p1952_p13, %p2178_p3  ;;  %p1958_p5 = por %p1957_p4, %p1956_p2 }
  0xda   : > { %v569_v63 = vpop.permute.xlu0 %568  ;;  %v1017_v34 = vpop.permute.xlu2 %1016 }
  0xdb   : > { %v1115_v28 = vsel %vm1111_vm4, %v1098_v37, %v569_v63  ;;  %p1954_p1 = pneg %p1953_p0 }
  0xdc   : > { %v579_v31 = vpop.permute.xlu1 %578 }
  0xdd   : > { %v1125_v43 = vsel %vm1111_vm4, %v1108_v42, %v579_v31  ;;  %p1959_p6 = pnand %p1958_p5, %p1954_p1 }
  0xe2   : > { %v625_v30 = vpop.permute.xlu0 %624  ;;  %v508_v41 = vpop.permute.xlu2 %507 }
  0xe3   : > { %v1132_v38 = vsel %vm1128_vm5, %v1115_v28, %v625_v30  ;;  %v1102_v9 = vsel %vm1094_vm3, %v2373_v23, %v508_v41 }
  0xe4   : > { %v825_v35 = vpop.permute.xlu1 %824  ;;  %v1149_v26 = vsel %vm1145_vm6, %v1132_v38, %v761_v21 }
  0xe5   : > { %v1166_v48 = vsel %vm1162_vm7, %v1149_v26, %v825_v35 }
  0xea   : > { %v635_v36 = vpop.permute.xlu0 %634  ;;  %v1091_v54 = vpop.permute.xlu2 %1090 }
  0xeb   : > { %v1142_v44 = vsel %vm1128_vm5, %v1125_v43, %v635_v36 }
  0xec   : > { %v835_v39 = vpop.permute.xlu1 %834  ;;  %v1159_v33 = vsel %vm1145_vm6, %v1142_v44, %v771_v11 }
  0xed   : > { %v1176_v57 = vsel %vm1162_vm7, %v1159_v33, %v835_v39 }
  0xf2   : > { %v881_v46 = vpop.permute.xlu0 %880  ;;  %v577_v60 = vpop.permute.xlu2 %576 }
  0xf3   : > { %v1183_v45 = vsel %vm1179_vm8, %v1166_v48, %v881_v46 }
  0xf4   : > { %v1200_v49 = vsel %vm1196_vm9, %v1183_v45, %v1017_v34  ;;  %v1081_v50 = vpop.permute.xlu1 %1080 }
  0xf5   : > { %v1217_v52 = vsel %vm1213_vm10, %v1200_v49, %v1081_v50 }
  0xf6   : > { %1683 = vmatmul.msk.bf16.gmra.mxu0 %vm1250_vm11, %v1217_v52 }
  0xfa   : > { %v891_v55 = vpop.permute.xlu0 %890  ;;  %v829_v3 = vpop.permute.xlu2 %828 }
  0xfb   : > { %v1193_v58 = vsel %vm1179_vm8, %v1176_v57, %v891_v55 }
  0xfc   : > { %v573_v56 = vpop.permute.xlu1 %572 }
  0xfd   : > { %v1119_v13 = vsel %vm1111_vm4, %v1102_v9, %v573_v56 }
 0x102   : > { %v1027_v47 = vpop.permute.xlu0 %1026  ;;  %v833_v6 = vpop.permute.xlu2 %832 }
 0x103   : > { %v1210_v4 = vsel %vm1196_vm9, %v1193_v58, %v1027_v47 }
 0x104   : > { %v1227_v2 = vsel %vm1213_vm10, %v1210_v4, %v1091_v54  ;;  %v629_v61 = vpop.permute.xlu1 %628 }
 0x105   : > { %1688 = vmatmul.msk.bf16.vlgmr.msra.gmra.mxu3 %vm1250_vm11, %v1227_v2  ;;  %v1136_v0 = vsel %vm1128_vm5, %v1119_v13, %v629_v61 }
 0x10a   : > { %v512_v62 = vpop.permute.xlu0 %511  ;;  %v1085_v20 = vpop.permute.xlu2 %1084 }
 0x10b   : > { %v1106_v15 = vsel %vm1094_vm3, %v2393_v53, %v512_v62 }
 0x10c   : > { %v633_v17 = vpop.permute.xlu1 %632  ;;  %v1123_v19 = vsel %vm1111_vm4, %v1106_v15, %v577_v60 }
 0x10d   : > { %v1140_v10 = vsel %vm1128_vm5, %v1123_v19, %v633_v17 }
 0x112   : > { %v765_v1 = vpop.permute.xlu0 %764  ;;  %v516_v27 = vpop.permute.xlu2 %515 }
 0x113   : > { %v1153_v51 = vsel %vm1145_vm6, %v1136_v0, %v765_v1  ;;  %v1110_v11 = vsel %vm1094_vm3, %v2487_v59, %v516_v27 }
 0x114   : > { %v885_v5 = vpop.permute.xlu1 %884  ;;  %v1170_v18 = vsel %vm1162_vm7, %v1153_v51, %v829_v3 }
 0x115   : > { %v1187_v40 = vsel %vm1179_vm8, %v1170_v18, %v885_v5 }
 0x11a   : > { %v769_v12 = vpop.permute.xlu0 %768  ;;  %v773_v35 = vpop.permute.xlu2 %772 }
 0x11b   : > { %v1157_v53 = vsel %vm1145_vm6, %v1140_v10, %v769_v12 }
 0x11c   : > { %v889_v14 = vpop.permute.xlu1 %888  ;;  %v1174_v22 = vsel %vm1162_vm7, %v1157_v53, %v833_v6 }
 0x11d   : > { %v1191_v24 = vsel %vm1179_vm8, %v1174_v22, %v889_v14 }
 0x122   : > { %v1021_v7 = vpop.permute.xlu0 %1020  ;;  %v1029_v41 = vpop.permute.xlu2 %1028 }
 0x123   : > { %v1204_v23 = vsel %vm1196_vm9, %v1187_v40, %v1021_v7 }
 0x124   : > { %v1221_v8 = vsel %vm1213_vm10, %v1204_v23, %v1085_v20  ;;  %v1089_v21 = vpop.permute.xlu1 %1088 }
 0x125   : > { %1685 = vmatmul.msk.bf16.gmra.mxu1 %vm1250_vm11, %v1221_v8 }
 0x12a   : > { %v1280_v16 = vpop.f32.mrf.mxu0  ;;  %v1025_v25 = vpop.permute.xlu0 %1024 }
 0x12b   : > { %1320 = vst [vmem:[%s2627_s30] sm:$0xff] %v1280_v16  ;;  %v1208_v32 = vsel %vm1196_vm9, %v1191_v24, %v1025_v25  ;;  %v1358_v55 = vmul.f32 %v1280_v16, %v1280_v16 }
 0x12c   : > { %v1225_v29 = vsel %vm1213_vm10, %v1208_v32, %v1089_v21  ;;  %v637_v63 = vpop.permute.xlu1 %636 }
 0x12d   : > { %1687 = vmatmul.msk.bf16.gmra.mxu2 %vm1250_vm11, %v1225_v29 }
 0x132   : > { %v1282_v31 = vpop.f32.mrf.mxu0  ;;  %v581_v30 = vpop.permute.xlu0 %580 }
 0x133   : > { %1321 = vst [vmem:[%s2627_s30 + $0x8] sm:$0xff] %v1282_v31  ;;  %v1127_v34 = vsel %vm1111_vm4, %v1110_v11, %v581_v30  ;;  %v1359_v54 = vmul.f32 %v1282_v31, %v1282_v31  ;;  %v1336_v43 = vadd.f32 %v1282_v31, %v1280_v16 }
 0x134   : > { %v1144_v36 = vsel %vm1128_vm5, %v1127_v34, %v637_v63  ;;  %v893_v39 = vpop.permute.xlu1 %892 }
 0x135   : > { %v1161_v28 = vsel %vm1145_vm6, %v1144_v36, %v773_v35  ;;  %v1374_v56 = vadd.f32 %v1359_v54, %v1358_v55 }
 0x13a   : > { %v837_v37 = vpop.permute.xlu0 %836 }
 0x13b   : > { %v1178_v38 = vsel %vm1162_vm7, %v1161_v28, %v837_v37 }
 0x13c   : > { %v1195_v59 = vsel %vm1179_vm8, %v1178_v38, %v893_v39 }
 0x13d   : > { %v1212_v26 = vsel %vm1196_vm9, %v1195_v59, %v1029_v41 }
 0x142   : > { %v1093_v46 = vpop.permute.xlu0 %1092 }
 0x143   : > { %v1229_v48 = vsel %vm1213_vm10, %v1212_v26, %v1093_v46 }
 0x144   : > { %1689 = vmatmul.msk.bf16.gmra.mxu3 %vm1250_vm11, %v1229_v48 }
 0x151   : > { %v1290_v45 = vpop.f32.mrf.mxu1 }
 0x152   : > { %1324 = vst [vmem:[%s2627_s30 + $0x20] sm:$0xff] %v1290_v45  ;;  %v1362_v60 = vmul.f32 %v1290_v45, %v1290_v45 }
 0x159   : > { %v1292_v49 = vpop.f32.mrf.mxu1  ;;  %v1300_v50 = vpop.f32.mrf.mxu2 }
 0x15a   : > { %1325 = vst [vmem:[%s2627_s30 + $0x28] sm:$0xff] %v1292_v49  ;;  %v1363_v5 = vmul.f32 %v1292_v49, %v1292_v49  ;;  %v1366_v20 = vmul.f32 %v1300_v50, %v1300_v50 }
 0x15b   : > { %1328 = vst [vmem:[%s2627_s30 + $0x40] sm:$0xff] %v1300_v50 }
 0x161   : > { %v1302_v52 = vpop.f32.mrf.mxu2 }
 0x162   : > { %1329 = vst [vmem:[%s2627_s30 + $0x48] sm:$0xff] %v1302_v52  ;;  %v1367_v19 = vmul.f32 %v1302_v52, %v1302_v52 }
 0x173   : > { %v1285_v42 = vpop.f32.mrf.mxu0 }
 0x174   : > { %1322 = vst [vmem:[%s2627_s30 + $0x10] sm:$0xff] %v1285_v42  ;;  %v1360_v44 = vmul.f32 %v1285_v42, %v1285_v42  ;;  %v1337_v33 = vadd.f32 %v1336_v43, %v1285_v42 }
 0x176   : > { %v1375_v58 = vadd.f32 %v1374_v56, %v1360_v44 }
 0x17b   : > { %v1287_v57 = vpop.f32.mrf.mxu0 }
 0x17c   : > { %1323 = vst [vmem:[%s2627_s30 + $0x18] sm:$0xff] %v1287_v57  ;;  %v1338_v47 = vadd.f32 %v1337_v33, %v1287_v57  ;;  %v1361_v4 = vmul.f32 %v1287_v57, %v1287_v57 }
 0x17e   : > { %v1339_v2 = vadd.f32 %v1338_v47, %v1290_v45  ;;  %v1376_v61 = vadd.f32 %v1375_v58, %v1361_v4 }
 0x180   : > { %v1377_v62 = vadd.f32 %v1376_v61, %v1362_v60  ;;  %v1340_v6 = vadd.f32 %v1339_v2, %v1292_v49 }
 0x182   : > { %v1378_v13 = vadd.f32 %v1377_v62, %v1363_v5 }
 0x188   : > { %v1310_v3 = vpop.f32.mrf.mxu3 }
 0x189   : > { %1332 = vst [vmem:[%s2627_s30 + $0x60] sm:$0xff] %v1310_v3  ;;  %v1370_v32 = vmul.f32 %v1310_v3, %v1310_v3 }
 0x190   : > { %v1312_v17 = vpop.f32.mrf.mxu3 }
 0x191   : > { %1333 = vst [vmem:[%s2627_s30 + $0x68] sm:$0xff] %v1312_v17  ;;  %v1371_v31 = vmul.f32 %v1312_v17, %v1312_v17 }
 0x1a2   : > { %v1295_v1 = vpop.f32.mrf.mxu1 }
 0x1a3   : > { %1326 = vst [vmem:[%s2627_s30 + $0x30] sm:$0xff] %v1295_v1  ;;  %v1364_v9 = vmul.f32 %v1295_v1, %v1295_v1  ;;  %v1341_v12 = vadd.f32 %v1340_v6, %v1295_v1 }
 0x1a5   : > { %v1379_v51 = vadd.f32 %v1378_v13, %v1364_v9 }
 0x1aa   : > { %v1297_v0 = vpop.f32.mrf.mxu1 }
 0x1ab   : > { %1327 = vst [vmem:[%s2627_s30 + $0x38] sm:$0xff] %v1297_v0  ;;  %v1342_v14 = vadd.f32 %v1341_v12, %v1297_v0  ;;  %v1365_v15 = vmul.f32 %v1297_v0, %v1297_v0 }
 0x1ad   : > { %v1380_v18 = vadd.f32 %v1379_v51, %v1365_v15  ;;  %v1343_v40 = vadd.f32 %v1342_v14, %v1300_v50 }
 0x1af   : > { %v1381_v23 = vadd.f32 %v1380_v18, %v1366_v20  ;;  %v1344_v8 = vadd.f32 %v1343_v40, %v1302_v52 }
 0x1b0   : > { %v1305_v7 = vpop.f32.mrf.mxu2 }
 0x1b1   : > { %1330 = vst [vmem:[%s2627_s30 + $0x50] sm:$0xff] %v1305_v7  ;;  %v1368_v10 = vmul.f32 %v1305_v7, %v1305_v7  ;;  %v1382_v53 = vadd.f32 %v1381_v23, %v1367_v19  ;;  %v1345_v21 = vadd.f32 %v1344_v8, %v1305_v7 }
 0x1b3   : > { %v1383_v24 = vadd.f32 %v1382_v53, %v1368_v10 }
 0x1b8   : > { %v1307_v22 = vpop.f32.mrf.mxu2 }
 0x1b9   : > { %1331 = vst [vmem:[%s2627_s30 + $0x58] sm:$0xff] %v1307_v22  ;;  %v1346_v16 = vadd.f32 %v1345_v21, %v1307_v22  ;;  %v1369_v25 = vmul.f32 %v1307_v22, %v1307_v22 }
 0x1bb   : > { %v1347_v27 = vadd.f32 %v1346_v16, %v1310_v3  ;;  %v1384_v29 = vadd.f32 %v1383_v24, %v1369_v25 }
 0x1bd   : > { %v1385_v63 = vadd.f32 %v1384_v29, %v1370_v32  ;;  %v1348_v30 = vadd.f32 %v1347_v27, %v1312_v17 }
 0x1bf   : > { %v1386_v36 = vadd.f32 %v1385_v63, %v1371_v31 }
 0x1c7   : > { %v1315_v11 = vpop.f32.mrf.mxu3 }
 0x1c8   : > { %1334 = vst [vmem:[%s2627_s30 + $0x70] sm:$0xff] %v1315_v11  ;;  %v1372_v34 = vmul.f32 %v1315_v11, %v1315_v11  ;;  %v1349_v35 = vadd.f32 %v1348_v30, %v1315_v11 }
 0x1ca   : > { %v1387_v28 = vadd.f32 %v1386_v36, %v1372_v34 }
 0x1cf   : > { %v1317_v37 = vpop.f32.mrf.mxu3 }
 0x1d0   : > { %1335 = vst [vmem:[%s2627_s30 + $0x78] sm:$0xff] %v1317_v37  ;;  %v1350_v38 = vadd.f32 %v1349_v35, %v1317_v37  ;;  %v1373_v39 = vmul.f32 %v1317_v37, %v1317_v37 }
 0x1d1   : > { %1962 = shalt.err (!%p1959_p6)
}
 0x1d2   : > { %s2099_s19 = smov 128   ;;  %s2771_s30 = smov 8   ;;  %v1351_v59 = vrot.slane %v1350_v38, 4  ;;  %v1388_v41 = vadd.f32 %v1387_v28, %v1373_v39 }
 0x1d3   : > { %1808 = dma.vmem_to_hbm [thread:$0]  (%p2178_p3), %s1421_s27, 2048, %s1423_s24, %s1397_s8, %s2099_s19, %s2099_s19, %s2771_s30  }
 0x1d4   : > { %s1435_s11 = sadd.s32 %s2073_s18, %s1695_s6  ;;  %v1352_v26 = vadd.f32 %v1351_v59, %v1350_v38  ;;  %v1389_v46 = vrot.slane %v1388_v41, 4  ;;  %s2772_s10 = sadd.s32 4294967295, %s2089_s22  }
 0x1d5   : > { %s1436_s9 = scalar_lea.hbm %s2762_s3, %s1435_s11  ;;  %s2683_s12 = sand.u32 1, %s2772_s10  }
 0x1d6   : > { %v1353_v48 = vrot.slane %v1352_v26, 2  ;;  %v1390_v45 = vadd.f32 %v1389_v46, %v1388_v41  ;;  %s1451_s24 = scalar_lea.hbm %s2763_s4, %s1435_s11  ;;  %s218_s27 = scalar_lea.vmem [#allocation4], %s2616_s14 }
 0x1d7   : > { %s2689_s18 = sshll.u32 %s218_s27, 4  ;;  %s2691_s6 = sshll.u32 %s1436_s9, 4  ;;  %s1439_s18 = int_to_ptr.vmem [resolvable:$true] %s2689_s18  ;;  %s1441_s6 = int_to_ptr.hbm [resolvable:$true] %s2691_s6 }
 0x1d8   : > { %v1354_v49 = vadd.f32 %v1353_v48, %v1352_v26  ;;  %v1391_v50 = vrot.slane %v1390_v45, 2  ;;  %s224_s8 = scalar_lea.vmem [#allocation6], %s2616_s14  ;;  %s2696_s30 = sshll.u32 %s1451_s24, 4  ;;  %s1456_s30 = int_to_ptr.hbm [resolvable:$true] %s2696_s30 }
 0x1d9   : > { %s2694_s19 = sshll.u32 %s224_s8, 4  ;;  %s1402_s0 = scalar_lea.sflag [#allocation5], %s2683_s12  ;;  %s1454_s19 = int_to_ptr.vmem [resolvable:$true] %s2694_s19 }
 0x1da   : > { %v1392_v52 = vadd.f32 %v1391_v50, %v1390_v45  ;;  %v1355_v42 = vrot.slane %v1354_v49, 1  ;;  %s1977_s11 = sshra.s32 %s1441_s6, 4  ;;  %s1983_s9 = scalar_lea.hbm %s2762_s3, 4  ;;  %s1978_s11 = int_to_ptr.hbm [resolvable:$true] %s1977_s11 }
 0x1db   : > { %s1979_s23 = scalar_lea.hbm %s1978_s11, 1  ;;  %p1984_p11 = scmp.lt.s32.totalorder %s1978_s11, %s2762_s3 }
 0x1dc   : > { %v1356_v54 = vadd.f32 %v1355_v42, %v1354_v49  ;;  %v1393_v55 = vrot.slane %v1392_v52, 1  ;;  %p1980_p7 = scmp.ne.s32.totalorder %s1978_s11, %s1979_s23  ;;  %p1985_p12 = scmp.lt.s32.totalorder %s1983_s9, %s1979_s23 }
 0x1de   : > { %1357 = vst [vmem:[%s218_s27] sm:$0x1] %v1356_v54  ;;  %v1394_v43 = vadd.f32 %v1393_v55, %v1392_v52  ;;  %p1981_p9 = pnand %p1980_p7, %p2178_p3  ;;  %p1986_p13 = por %p1985_p12, %p1984_p11 }
 0x1e0   : > { %p1982_p10 = pneg %p1981_p9 }
 0x1e2   : > { %p1987_p0 = pnand %p1986_p13, %p1982_p10 }
 0x1e4   : > { %1990 = shalt.err (!%p1987_p0)
}
 0x1e5   : > { %1809 = dma.vmem_to_hbm [thread:$0]  (%p2178_p3), %s1439_s18, 16, %s1441_s6, %s1402_s0   ;;  %1395 = vst [vmem:[%s224_s8] sm:$0x1] %v1394_v43 }
 0x1e6   : > { %s2005_s12 = sshra.s32 %s1456_s30, 4  ;;  %s2011_s23 = scalar_lea.hbm %s2763_s4, 4  ;;  %s2006_s12 = int_to_ptr.hbm [resolvable:$true] %s2005_s12 }
 0x1e7   : > { %s2007_s24 = scalar_lea.hbm %s2006_s12, 1  ;;  %p2012_p5 = scmp.lt.s32.totalorder %s2006_s12, %s2763_s4 }
 0x1e8   : > { %p2008_p1 = scmp.ne.s32.totalorder %s2006_s12, %s2007_s24  ;;  %p2013_p6 = scmp.lt.s32.totalorder %s2011_s23, %s2007_s24 }
 0x1ea   : > { %p2009_p2 = pnand %p2008_p1, %p2178_p3  ;;  %p2014_p7 = por %p2013_p6, %p2012_p5 }
 0x1ec   : > { %p2010_p4 = pneg %p2009_p2 }
 0x1ee   : > { %p2015_p9 = pnand %p2014_p7, %p2010_p4 }
 0x1f0   : > { %2018 = shalt.err (!%p2015_p9)
}
 0x1f1   : > { %1810 = dma.vmem_to_hbm [thread:$0]  (%p2178_p3), %s1454_s19, 16, %s1456_s30, %s1402_s0  }
 0x1f2 PF: > { %p1824_p10 = scmp.ge.s32.totalorder %s2089_s22, 2  ;;  %s1467_s18 = sand.u32 1, %s2061_s15  }
 0x1f3   : > { %s1468_s6 = scalar_lea.sflag [#allocation3], %s1467_s18 }
 0x1f4   : > { %p1815_p11 = pnand %p1824_p10, %p2189_p8 }
 0x1f6   : > { %p1816_p12 = pneg %p1815_p11 }
 0x1f8   : > { %2052 = dma.done.wait (%p1816_p12), %s1468_s6, 2048  }
 0x1f9   : > { %2054 = vsyncadd (%p1816_p12), %s1468_s6, 4294965248  ;;  %s2773_s8 = sadd.s32 4294967294, %s2089_s22  }
 0x1fa   : > { %s1477_s28 = sand.u32 1, %s2773_s8  }
 0x1fb   : > { %s1478_s9 = scalar_lea.sflag [#allocation5], %s1477_s28 }
 0x1fc   : > { %2056 = dma.done.wait (%p1816_p12), %s1478_s9, 32  }
 0x1fd   : > { %2058 = vsyncadd (%p1816_p12), %s1478_s9, 4294967264  ;;  %s21_s22 = sadd.s32 1, %s2089_s22   ;;  %s2774_s15 = smov %s2065_s16 }
 0x1fe   : > { %p18_p3 = scmp.ge.s32.totalorder %s21_s22, 6   ;;  %s2775_s16 = smov %s2069_s17 }
 0x1ff   : > { %s2776_s17 = smov %s2198_s7  ;;  %s2777_s18 = smov %s2081_s20 }
 0x200   : > { %s2778_s19 = smov %s2085_s21  ;;  %s2779_s20 = smov %s2782_s25 }
 0x201   : > { %s2780_s21 = smov %s2786_s26  ;;  %20 = sbr.rel (!%p18_p3) target bundleno = 9 (0x9), region = 98 }
 0x206   :  { %1492 = vsyncpa [#allocation3], 1 }
 0x207   :  { %1494 = vsyncpa [#allocation3 + $0x1], 1 }
 0x208   :  { %1495 = vsyncpa [#allocation5], 1 }
 0x209   :  { %1497 = vsyncpa [#allocation5 + $0x1], 1 }

</bundles_post_ra>
